<compile_context>
chip_gen: v7x
topology: tpu7x:2x2x1
jax: 0.10.0
libtpu: 0.0.40
codegen_flags: <defaults>
</compile_context>

<pallas_src>
import jax
import jax.numpy as jnp
from jax.experimental import pallas as pl
from jax.experimental.pallas import tpu as pltpu

_LANE = 128
_SUB = 8                                   # f32 sublanes per vreg
_TARGET_BLOCK_BYTES = 4 * 1024 * 1024      # ~4 MiB/block -> ~8 MiB double-buffered
_VMEM_LIMIT_BYTES = 32 * 1024 * 1024       # safe on v5e/v6e/v7x, room for big blocks

_NUM_TC_CACHE = None


def _fill_values(dtype):
    """Neutral fill values for the running-min / running-max accumulators."""
    if jnp.issubdtype(dtype, jnp.floating):
        return float("-inf"), float("inf")
    if jnp.issubdtype(dtype, jnp.integer):
        info = jnp.iinfo(dtype)
        return int(info.min), int(info.max)
    raise TypeError(f"CheckRange: unsupported dtype {dtype}")


def _acc_sublanes(dtype):
    """Sublane count of one full packed vreg for this dtype (8/16/32)."""
    itemsize = jnp.dtype(dtype).itemsize
    return _SUB * max(1, 4 // itemsize)


def _num_tensorcores():
    """Best-effort TensorCores-per-chip query (v7x: 2; v5e/v6e: 1)."""
    global _NUM_TC_CACHE
    if _NUM_TC_CACHE is not None:
        return _NUM_TC_CACHE
    n = 1
    try:
        info = pltpu.get_tpu_info()
        for attr in ("num_cores", "core_count", "num_tensorcores",
                     "tensorcores_per_chip", "num_tensor_cores"):
            v = getattr(info, attr, None)
            if isinstance(v, int) and v > 0:
                n = v
                break
    except Exception:
        n = 1
    _NUM_TC_CACHE = max(1, n)
    return _NUM_TC_CACHE


def _make_minmax_kernel(block_rows, acc_sub, lo_fill, hi_fill):
    n_groups = block_rows // acc_sub

    def kernel(x_ref, min_out_ref, max_out_ref, min_acc, max_acc):
        i = pl.program_id(1)  # reduction axis ("arbitrary")

        @pl.when(i == 0)
        def _():
            min_acc[...] = jnp.full((acc_sub, _LANE), hi_fill, min_acc.dtype)
            max_acc[...] = jnp.full((acc_sub, _LANE), lo_fill, max_acc.dtype)

        # Pure elementwise VPU min/max over the leading (vreg-group) axis into a
        # full-vreg accumulator.  No masks, no XLU work in the inner loop.
        blk = x_ref[...].reshape(n_groups, acc_sub, _LANE)
        min_acc[...] = jnp.minimum(min_acc[...], jnp.min(blk, axis=0))
        max_acc[...] = jnp.maximum(max_acc[...], jnp.max(blk, axis=0))

        @pl.when(i == pl.num_programs(1) - 1)
        def _():
            # One-time cross-lane/sublane XLU reduce; native-dtype writeback
            # (exact for ints, unlike a float32 round-trip).
            min_out_ref[...] = (
                jnp.min(min_acc[...], keepdims=True)
                .reshape(1, 1, 1)
                .astype(min_out_ref.dtype)
            )
            max_out_ref[...] = (
                jnp.max(max_acc[...], keepdims=True)
                .reshape(1, 1, 1)
                .astype(max_out_ref.dtype)
            )

    return kernel


def _pallas_minmax_2d(arr):
    """Min/max over the leading FULL blocks of a (rows, 128) array.

    Returns (mn, mx, rows_covered).  rows_covered <= rows; the caller reduces
    the remaining rows, so the kernel never needs a partial-block mask.
    """
    rows = arr.shape[0]
    dtype = arr.dtype
    lo_fill, hi_fill = _fill_values(dtype)
    itemsize = jnp.dtype(dtype).itemsize
    acc_sub = _acc_sublanes(dtype)

    # ~4 MiB blocks regardless of dtype, rounded to whole packed vregs.
    pref_rows = max(
        acc_sub, (_TARGET_BLOCK_BYTES // (_LANE * itemsize)) // acc_sub * acc_sub
    )
    block_rows = min(pref_rows, (rows // acc_sub) * acc_sub)
    nb = rows // block_rows  # full blocks only

    # v7x: shard blocks across the 2 TensorCores when there is enough work per
    # core; v5e/v6e (1 TC) keep a trivial size-1 leading axis (no extra steps).
    num_cores = 2 if (_num_tensorcores() >= 2 and nb >= 16) else 1
    blocks_per_core = nb // num_cores
    covered = num_cores * blocks_per_core * block_rows

    if num_cores == 2:
        core_sem = getattr(pltpu, "CORE_PARALLEL", "parallel")
        dim_sems = (core_sem, "arbitrary")
    else:
        dim_sems = ("arbitrary", "arbitrary")

    kernel = _make_minmax_kernel(block_rows, acc_sub, lo_fill, hi_fill)

    min_out, max_out = pl.pallas_call(
        kernel,
        out_shape=(
            jax.ShapeDtypeStruct((num_cores, 1, 1), dtype),
            jax.ShapeDtypeStruct((num_cores, 1, 1), dtype),
        ),
        grid_spec=pltpu.PrefetchScalarGridSpec(
            num_scalar_prefetch=0,
            grid=(num_cores, blocks_per_core),
            in_specs=[
                pl.BlockSpec(
                    (block_rows, _LANE),
                    lambda c, i: (c * blocks_per_core + i, 0),
                )
            ],
            out_specs=[
                pl.BlockSpec((1, 1, 1), lambda c, i: (c, 0, 0)),
                pl.BlockSpec((1, 1, 1), lambda c, i: (c, 0, 0)),
            ],
            scratch_shapes=[
                pltpu.VMEM((acc_sub, _LANE), dtype),   # running per-lane min
                pltpu.VMEM((acc_sub, _LANE), dtype),   # running per-lane max
            ],
        ),
        compiler_params=pltpu.CompilerParams(
            dimension_semantics=dim_sems,
            vmem_limit_bytes=_VMEM_LIMIT_BYTES,
        ),
    )(arr)

    # Combine the (at most 2) per-core partials; trivial.
    return jnp.min(min_out), jnp.max(max_out), covered


def _pallas_minmax(x):
    """Global (min, max) of x, returned as a (2,) array in x's native dtype."""
    flat = x.reshape(-1)
    n = flat.shape[0]
    if n == 0:
        raise ValueError("CheckRange: empty input")
    _fill_values(x.dtype)  # dtype support check
    acc_sub = _acc_sublanes(x.dtype)

    rows = n // _LANE
    lane_tail = n - rows * _LANE

    if rows < acc_sub:
        # Tiny input (< one packed vreg worth of rows): not worth a kernel launch.
        return jnp.stack([jnp.min(flat), jnp.max(flat)])

    if lane_tail == 0:
        arr = flat.reshape(rows, _LANE)  # contiguous reshape: zero-copy
    else:
        # Element counts not divisible by 128 force one copy of the bulk region
        # (rare for NN tensors); the <128-element tail is folded in below.
        arr = flat[: rows * _LANE].reshape(rows, _LANE)

    mn, mx, covered = _pallas_minmax_2d(arr)

    if covered < rows:
        # Row tail (< one block): tiny fused XLA reduce; keeps the kernel's
        # inner loop completely mask-free on every step.
        t = arr[covered:, :]
        mn = jnp.minimum(mn, jnp.min(t))
        mx = jnp.maximum(mx, jnp.max(t))
    if lane_tail:
        t = flat[rows * _LANE:]
        mn = jnp.minimum(mn, jnp.min(t))
        mx = jnp.maximum(mx, jnp.max(t))

    return jnp.stack([mn, mx])


_minmax_jit = jax.jit(_pallas_minmax)


class CheckRange:
    """Pallas/JAX port of torchmore2.layers.CheckRange.

    NOTE: NaN inputs fail the lower-bound assert (NaN >= lo is False), matching
    the implicit NaN behavior of the PyTorch original.
    """

    def __init__(self, lo: float = -100000.0, hi: float = 100000.0, name: str = ""):
        self.name = name
        self.valid = (lo, hi)

    def __call__(self, x):
        # Single device->host transfer for both extrema, in native dtype.
        vals = jax.device_get(_minmax_jit(x))
        mn = vals[0].item()
        mx = vals[1].item()
        assert mn >= self.valid[0], (self.name, mn, self.valid)
        assert mx <= self.valid[1], (self.name, mx, self.valid)
        return x  # identity pass-through, same shape/dtype as input

    forward = __call__

    def __repr__(self):
        return 'CheckRange({}, {}, name="{}")'.format(
            self.valid[0], self.valid[1], self.name
        )


if __name__ == "__main__":
    key = jax.random.PRNGKey(0)

    # Primary test: small NCHW input through the layer (identity + range check).
    x = jax.random.normal(key, (2, 4, 16, 16), dtype=jnp.float32)
    layer = CheckRange(lo=-100000.0, hi=100000.0, name="test")
    y = layer(x)
    y = jax.block_until_ready(y)
    assert y.shape == x.shape and y.dtype == x.dtype
    assert bool(jnp.all(y == x))

    # Reduction correctness vs. jnp across code paths:
    #   (2,4,16,16)     single small block, 128-divisible
    #   (4,8,64,128)    one larger block, 128-divisible
    #   (16,8,128,128)  multi-block streaming (accumulator across grid steps)
    #   (25,8,100,128)  multi-block + wrapper row-tail reduce
    #   (2,3,10,64)     row tail only
    #   (3,5,7,11)      row tail + sub-128 lane tail
    for i, shape in enumerate([
        (2, 4, 16, 16), (4, 8, 64, 128), (16, 8, 128, 128),
        (25, 8, 100, 128), (2, 3, 10, 64), (3, 5, 7, 11),
    ]):
        xi = jax.random.normal(jax.random.PRNGKey(i), shape, dtype=jnp.float32) * 10.0
        got = jax.device_get(_minmax_jit(xi))
        ref = jax.device_get(jnp.stack([jnp.min(xi), jnp.max(xi)]))
        assert abs(float(got[0]) - float(ref[0])) < 1e-5, (shape, got, ref)
        assert abs(float(got[1]) - float(ref[1])) < 1e-5, (shape, got, ref)

    # int32: extrema transported in the native dtype (exact beyond 2**24).
    xi = jax.random.randint(jax.random.PRNGKey(100), (2, 4, 16, 16),
                            minval=-(2 ** 30), maxval=2 ** 30, dtype=jnp.int32)
    got = jax.device_get(_minmax_jit(xi))
    assert int(got[0]) == int(jnp.min(xi)), (got, jnp.min(xi))
    assert int(got[1]) == int(jnp.max(xi)), (got, jnp.max(xi))

    # bfloat16: full packed-vreg (16,128) accumulator path.
    xb = (jax.random.normal(jax.random.PRNGKey(101), (2, 4, 16, 16)) * 10.0).astype(
        jnp.bfloat16
    )
    got = jax.device_get(_minmax_jit(xb))
    assert float(got[0]) == float(jnp.min(xb)), (got, jnp.min(xb))
    assert float(got[1]) == float(jnp.max(xb)), (got, jnp.max(xb))

    print("KERNEL_OK")
</pallas_src>

<mosaic_0001>
module attributes {stable_mosaic.version = 11 : i64} {
  func.func @kernel(%arg0: i32, %arg1: i32, %arg2: memref<16x128xf32, #tpu.memory_space<vmem>>, %arg3: memref<1x1x1xf32, #tpu.memory_space<vmem>>, %arg4: memref<1x1x1xf32, #tpu.memory_space<vmem>>, %arg5: memref<8x128xf32, #tpu.memory_space<vmem>>, %arg6: memref<8x128xf32, #tpu.memory_space<vmem>>) attributes {dimension_semantics = [#tpu.dimension_semantics<arbitrary>, #tpu.dimension_semantics<arbitrary>], iteration_bounds = array<i64: 1, 1>, scalar_prefetch = 0 : i64, scratch_operands = 2 : i64, tpu.core_type = #tpu.core_type<tc>, window_params = [{transform_indices = @transform_0, window_bounds = array<i64: 16, 128>}, {transform_indices = @transform_1, window_bounds = array<i64: 1, 1, 1>}, {transform_indices = @transform_2, window_bounds = array<i64: 1, 1, 1>}]} {
    %c0_i32 = arith.constant 0 : i32
    %0 = arith.cmpi eq, %arg1, %c0_i32 : i32
    %1 = arith.extui %0 : i1 to i32
    %c0_i32_0 = arith.constant 0 : i32
    %2 = arith.cmpi ne, %1, %c0_i32_0 : i32
    scf.if %2 {
      %cst_13 = arith.constant 0x7F800000 : f32
      %16 = vector.broadcast %cst_13 : f32 to vector<8x128xf32>
      %c0_14 = arith.constant 0 : index
      %c0_15 = arith.constant 0 : index
      %17 = vector.load %arg5[%c0_14, %c0_15] : memref<8x128xf32, #tpu.memory_space<vmem>>, vector<8x128xf32>
      tpu.vector_store %arg5[%c0_14, %c0_15], %16 {strides = array<i32>} : memref<8x128xf32, #tpu.memory_space<vmem>>, vector<8x128xf32>,
      %cst_16 = arith.constant 0xFF800000 : f32
      %18 = vector.broadcast %cst_16 : f32 to vector<8x128xf32>
      %c0_17 = arith.constant 0 : index
      %c0_18 = arith.constant 0 : index
      %19 = vector.load %arg6[%c0_17, %c0_18] : memref<8x128xf32, #tpu.memory_space<vmem>>, vector<8x128xf32>
      tpu.vector_store %arg6[%c0_17, %c0_18], %18 {strides = array<i32>} : memref<8x128xf32, #tpu.memory_space<vmem>>, vector<8x128xf32>,
    } else {
    }
    %c0 = arith.constant 0 : index
    %c0_1 = arith.constant 0 : index
    %3 = vector.load %arg2[%c0, %c0_1] : memref<16x128xf32, #tpu.memory_space<vmem>>, vector<16x128xf32>
    %4 = vector.shape_cast %3 : vector<16x128xf32> to vector<2x8x128xf32>
    %c0_2 = arith.constant 0 : index
    %c0_3 = arith.constant 0 : index
    %5 = vector.load %arg5[%c0_2, %c0_3] : memref<8x128xf32, #tpu.memory_space<vmem>>, vector<8x128xf32>
    %cst = arith.constant dense<0x7F800000> : vector<8x128xf32>
    %6 = vector.multi_reduction <minimumf>, %4, %cst [0] : vector<2x8x128xf32> to vector<8x128xf32>
    %7 = arith.minimumf %5, %6 : vector<8x128xf32>
    %c0_4 = arith.constant 0 : index
    %c0_5 = arith.constant 0 : index
    %8 = vector.load %arg5[%c0_4, %c0_5] : memref<8x128xf32, #tpu.memory_space<vmem>>, vector<8x128xf32>
    tpu.vector_store %arg5[%c0_4, %c0_5], %7 {strides = array<i32>} : memref<8x128xf32, #tpu.memory_space<vmem>>, vector<8x128xf32>,
    %c0_6 = arith.constant 0 : index
    %c0_7 = arith.constant 0 : index
    %9 = vector.load %arg6[%c0_6, %c0_7] : memref<8x128xf32, #tpu.memory_space<vmem>>, vector<8x128xf32>
    %cst_8 = arith.constant dense<0xFF800000> : vector<8x128xf32>
    %10 = vector.multi_reduction <maximumf>, %4, %cst_8 [0] : vector<2x8x128xf32> to vector<8x128xf32>
    %11 = arith.maximumf %9, %10 : vector<8x128xf32>
    %c0_9 = arith.constant 0 : index
    %c0_10 = arith.constant 0 : index
    %12 = vector.load %arg6[%c0_9, %c0_10] : memref<8x128xf32, #tpu.memory_space<vmem>>, vector<8x128xf32>
    tpu.vector_store %arg6[%c0_9, %c0_10], %11 {strides = array<i32>} : memref<8x128xf32, #tpu.memory_space<vmem>>, vector<8x128xf32>,
    %c0_i32_11 = arith.constant 0 : i32
    %13 = arith.cmpi eq, %arg1, %c0_i32_11 : i32
    %14 = arith.extui %13 : i1 to i32
    %c0_i32_12 = arith.constant 0 : i32
    %15 = arith.cmpi ne, %14, %c0_i32_12 : i32
    scf.if %15 {
      %c0_13 = arith.constant 0 : index
      %c0_14 = arith.constant 0 : index
      %16 = vector.load %arg5[%c0_13, %c0_14] : memref<8x128xf32, #tpu.memory_space<vmem>>, vector<8x128xf32>
      %17 = vector.shape_cast %16 : vector<8x128xf32> to vector<1x8x128xf32>
      %cst_15 = arith.constant dense<0x7F800000> : vector<1xf32>
      %18 = vector.multi_reduction <minimumf>, %17, %cst_15 [1, 2] : vector<1x8x128xf32> to vector<1xf32>
      %19 = vector.shape_cast %18 : vector<1xf32> to vector<1x1x1xf32>
      %20 = vector.extract %19[0, 0, 0] : f32 from vector<1x1x1xf32>
      %21 = vector.broadcast %20 : f32 to vector<1x1xf32>
      %22 = vector.shape_cast %21 : vector<1x1xf32> to vector<1x1x1xf32>
      %c0_16 = arith.constant 0 : index
      %c0_17 = arith.constant 0 : index
      %c0_18 = arith.constant 0 : index
      %23 = vector.load %arg3[%c0_16, %c0_17, %c0_18] : memref<1x1x1xf32, #tpu.memory_space<vmem>>, vector<1x1x1xf32>
      tpu.vector_store %arg3[%c0_16, %c0_17, %c0_18], %22 {strides = array<i32>} : memref<1x1x1xf32, #tpu.memory_space<vmem>>, vector<1x1x1xf32>,
      %c0_19 = arith.constant 0 : index
      %c0_20 = arith.constant 0 : index
      %24 = vector.load %arg6[%c0_19, %c0_20] : memref<8x128xf32, #tpu.memory_space<vmem>>, vector<8x128xf32>
      %25 = vector.shape_cast %24 : vector<8x128xf32> to vector<1x8x128xf32>
      %cst_21 = arith.constant dense<0xFF800000> : vector<1xf32>
      %26 = vector.multi_reduction <maximumf>, %25, %cst_21 [1, 2] : vector<1x8x128xf32> to vector<1xf32>
      %27 = vector.shape_cast %26 : vector<1xf32> to vector<1x1x1xf32>
      %28 = vector.extract %27[0, 0, 0] : f32 from vector<1x1x1xf32>
      %29 = vector.broadcast %28 : f32 to vector<1x1xf32>
      %30 = vector.shape_cast %29 : vector<1x1xf32> to vector<1x1x1xf32>
      %c0_22 = arith.constant 0 : index
      %c0_23 = arith.constant 0 : index
      %c0_24 = arith.constant 0 : index
      %31 = vector.load %arg4[%c0_22, %c0_23, %c0_24] : memref<1x1x1xf32, #tpu.memory_space<vmem>>, vector<1x1x1xf32>
      tpu.vector_store %arg4[%c0_22, %c0_23, %c0_24], %30 {strides = array<i32>} : memref<1x1x1xf32, #tpu.memory_space<vmem>>, vector<1x1x1xf32>,
    } else {
    }
    return
  }
  func.func @transform_0(%arg0: i32, %arg1: i32) -> (i32, i32) {
    %c1_i32 = arith.constant 1 : i32
    %0 = arith.muli %arg0, %c1_i32 : i32
    %1 = arith.addi %0, %arg1 : i32
    %c0_i32 = arith.constant 0 : i32
    %c0_i32_0 = arith.constant 0 : i32
    return %1, %c0_i32 : i32, i32
  }
  func.func @transform_1(%arg0: i32, %arg1: i32) -> (i32, i32, i32) {
    %c0_i32 = arith.constant 0 : i32
    %c0_i32_0 = arith.constant 0 : i32
    %c0_i32_1 = arith.constant 0 : i32
    return %arg0, %c0_i32, %c0_i32_0 : i32, i32, i32
  }
  func.func @transform_2(%arg0: i32, %arg1: i32) -> (i32, i32, i32) {
    %c0_i32 = arith.constant 0 : i32
    %c0_i32_0 = arith.constant 0 : i32
    %c0_i32_1 = arith.constant 0 : i32
    return %arg0, %c0_i32, %c0_i32_0 : i32, i32, i32
  }
}

</mosaic_0001>

<bundles_post_ra>
// kernel: _pallas_minmax.1
= control target key start
LH: loop header
LB: loop body
LE: loop exit
PB: predicated region body
PF: predicated region fallthrough
CT: control target
= control target key end

     0   :  { %8 = vsyncpa [#allocation5], 0  ;;  %s215_s0 = inlined_call_operand.vmem [shape: f32[16,128], index: 0, kind: input, shape index: {}]   ;;  %s216_s1 = inlined_call_operand.hbm [shape: f32[1,1,1], index: 1, kind: output, shape index: {0}]   ;;  %s217_s2 = inlined_call_operand.hbm [shape: f32[1,1,1], index: 2, kind: output, shape index: {1}]  }
   0x1   :  { %v40_v0 = vld [vmem:[%s215_s0] sm:$0xff]  ;;  %v41_v1 = vld [vmem:[%s215_s0 + $0x8] sm:$0xff] }
   0x2   :  { %9 = vsyncpa [#allocation7], 0  ;;  %v43_v2 = vmin.f32 %v40_v0, %v41_v1  ;;  %v47_v3 = vmax.f32 %v40_v0, %v41_v1  ;;  %s166_s0 = smov [#allocation4]   ;;  %vm64_vm0 = vcmask 0   ;;  %s167_s15 = smov [#allocation6]  }
   0x3   :  { %s84_s13 = sshll.u32 %s166_s0, 4  ;;  %s94_s16 = sshll.u32 %s167_s15, 4  ;;  %s85_s13 = int_to_ptr.vmem [resolvable:$true] %s84_s13  ;;  %s95_s16 = int_to_ptr.vmem [resolvable:$true] %s94_s16 }
   0x4   :  { %54 = vmin.xlane.f32.xlu0 %v43_v2  ;;  %s118_s17 = scalar_lea.vmem %s85_s13, 16  ;;  %s122_s18 = scalar_lea.vmem %s85_s13, 32 }
   0x5   :  { %p119_p0 = scmp.ne.s32.totalorder %s85_s13, %s118_s17  ;;  %p123_p1 = scmp.lt.s32.totalorder %s85_s13, %s85_s13 }
   0x6   :  { %p124_p2 = scmp.lt.s32.totalorder %s122_s18, %s118_s17 }
   0x8   :  { %67 = vmax.xlane.f32.xlu0 %v47_v3  ;;  %p125_p3 = por %p124_p2, %p123_p1 }
   0xa   :  { %p126_p4 = pnand %p125_p3, %p119_p0 }
  0x91   :  { %v55_v4 = vpop.xlane.xlu0 %54 }
  0x92   :  { %v56_v5 = vrot.slane %v55_v4, 4 }
  0x94   :  { %v57_v6 = vmin.f32 %v55_v4, %v56_v5 }
  0x95   :  { %v68_v7 = vpop.xlane.xlu0 %67 }
  0x96   :  { %v58_v8 = vrot.slane %v57_v6, 2  ;;  %v69_v9 = vrot.slane %v68_v7, 4 }
  0x98   :  { %v70_v10 = vmax.f32 %v68_v7, %v69_v9  ;;  %v59_v11 = vmin.f32 %v57_v6, %v58_v8 }
  0x9a   :  { %v71_v12 = vrot.slane %v70_v10, 2  ;;  %v60_v13 = vrot.slane %v59_v11, 1 }
  0x9c   :  { %v72_v14 = vmax.f32 %v70_v10, %v71_v12  ;;  %v61_v15 = vmin.f32 %v59_v11, %v60_v13 }
  0x9e   :  { %112 = vpush %v61_v15  ;;  %v73_v16 = vrot.slane %v72_v14, 1 }
  0xa0   :  { %v74_v17 = vmax.f32 %v72_v14, %v73_v16 }
  0xa2   :  { %114 = vpush %v74_v17 }
  0xcf   :  { %s113_s14 = spop %112 }
  0xd0   :  { %v63_v18 = vstv %s113_s14 }
  0xd1   :  { %65 = vst.msk [vmem:[#allocation4] sm:$0x1] %vm64_vm0, %v63_v18 }
  0xd2   :  { %129 = shalt.err (!%p126_p4)
}
  0xd3   :  { %s130_s21 = scalar_lea.hbm %s216_s1, 16 }
  0xd4   :  { %p131_p5 = scmp.ne.s32.totalorder %s216_s1, %s130_s21  ;;  %p134_p6 = scmp.lt.u32.totalorder %s130_s21, %s216_s1 }
  0xd6   :  { %p136_p7 = pnand %p134_p6, %p131_p5 }
  0xd8   :  { %139 = shalt.err (!%p136_p7)
}
  0xd9   :  { %87 = dma.vmem_to_hbm [thread:$0]  %s85_s13, 16, %s216_s1, [#allocation5]  }
  0xda   :  { %s115_s28 = spop %114  ;;  %s140_s29 = scalar_lea.vmem %s95_s16, 16 }
  0xdb   :  { %v76_v19 = vstv %s115_s28  ;;  %p141_p8 = scmp.ne.s32.totalorder %s95_s16, %s140_s29  ;;  %s144_s30 = scalar_lea.vmem %s95_s16, 32 }
  0xdc   :  { %77 = vst.msk [vmem:[#allocation6] sm:$0x1] %vm64_vm0, %v76_v19  ;;  %p145_p9 = scmp.lt.s32.totalorder %s95_s16, %s95_s16  ;;  %p146_p10 = scmp.lt.s32.totalorder %s144_s30, %s140_s29 }
  0xde   :  { %p147_p11 = por %p146_p10, %p145_p9 }
  0xe0   :  { %p148_p12 = pnand %p147_p11, %p141_p8 }
  0xe2   :  { %151 = shalt.err (!%p148_p12)
}
  0xe3   :  { %s152_s5 = scalar_lea.hbm %s217_s2, 16 }
  0xe4   :  { %p153_p13 = scmp.ne.s32.totalorder %s217_s2, %s152_s5  ;;  %p156_p0 = scmp.lt.u32.totalorder %s152_s5, %s217_s2 }
  0xe6   :  { %p158_p1 = pnand %p156_p0, %p153_p13 }
  0xe8   :  { %161 = shalt.err (!%p158_p1)
}
  0xe9   :  { %97 = dma.vmem_to_hbm [thread:$0]  %s95_s16, 16, %s217_s2, [#allocation7]  }
  0xea   :  { %162 = dma.done.wait [#allocation5], 16  }
  0xeb   :  { %163 = vsyncadd [#allocation5], 4294967280 }
  0xec   :  { %164 = dma.done.wait [#allocation7], 16  }
  0xed   :  { %165 = vsyncadd [#allocation7], 4294967280 }
  0xee   :  { %104 = vsyncpa [#allocation5], 1 }
  0xef   :  { %105 = vsyncpa [#allocation7], 1 }

</bundles_post_ra>
